<compile_context>
chip_gen: v7x
topology: tpu7x:2x2x1
jax: 0.10.0
libtpu: 0.0.40
codegen_flags: <defaults>
</compile_context>

<pallas_src>
import functools

import jax
import jax.numpy as jnp
from jax.experimental import pallas as pl
from jax.experimental.pallas import tpu as pltpu

_LANES = 128


def _sublane_rows(dtype) -> int:
    """Minimum sublane packing for a dtype: f32 -> 8, bf16 -> 16, int8/fp8 -> 32."""
    itemsize = jnp.dtype(dtype).itemsize
    return max(8, 32 // max(itemsize, 1))


def _chip_params():
    """Per-generation block-size / TensorCore-count defaults (safe fallback)."""
    kind = ""
    try:
        kind = jax.devices()[0].device_kind.lower()
    except Exception:  # pragma: no cover - backend not initialized yet
        pass
    if "v7" in kind or "tpu7" in kind or "7x" in kind:
        # v7x: 2 TCs/chip, 64 MiB VMEM (32 MiB scoped default), ~3.2 TB/s HBM.
        return 6 * 1024 * 1024, 2
    if "v6" in kind:
        # v6e: 1 TC, 32 MiB scoped-VMEM default.
        return 4 * 1024 * 1024, 1
    # v5e / unknown: 16 MiB scoped-VMEM default -> keep 2 MiB blocks.
    return 2 * 1024 * 1024, 1


def _sigmoid_range_kernel(x_ref, o_ref, *, scale, shift, upcast):
    x = x_ref[...]
    xf = x.astype(jnp.float32) if upcast else x
    # sigmoid(x)*(high-low)+low == 0.5*(high-low)*tanh(x/2) + 0.5*(high+low)
    y = jnp.tanh(xf * 0.5) * scale + shift
    o_ref[...] = y.astype(o_ref.dtype)


def _sigmoid_range_xla(x, scale, shift):
    """Plain-XLA fallback for tiny inputs / ragged tails (fuses into one op)."""
    xf = x.astype(jnp.float32)
    return (jnp.tanh(xf * 0.5) * scale + shift).astype(x.dtype)


def sigmoid_range(x, high, low, *, target_block_bytes=None,
                  min_pallas_bytes=256 * 1024):
    """sigmoid(x) * (high - low) + low, elementwise, via a Pallas TPU kernel.

    `high`/`low` are Python scalars (as in the nn.Module spec); they are folded
    into the kernel at trace time.
    """
    high = float(high)
    low = float(low)
    scale = 0.5 * (high - low)
    shift = 0.5 * (high + low)

    orig_shape = x.shape
    dtype = x.dtype
    n = x.size
    itemsize = jnp.dtype(dtype).itemsize
    sub = _sublane_rows(dtype)

    if n == 0:
        return x
    # Small-input bail-out: a fused XLA elementwise op beats pallas_call fixed cost.
    if n * itemsize < min_pallas_bytes:
        return _sigmoid_range_xla(x, scale, shift)

    default_block_bytes, num_tc = _chip_params()
    if target_block_bytes is None:
        target_block_bytes = default_block_bytes

    x_flat = jnp.ravel(x)
    n_tail = n % _LANES
    n_main = n - n_tail
    if n_main == 0:
        return _sigmoid_range_xla(x, scale, shift)

    # Lane-dense slab: widen beyond 128 lanes when the aligned size allows.
    width = _LANES
    for w in (512, 256):
        if n_main % w == 0:
            width = w
            break
    rows = n_main // width
    x2d = x_flat[:n_main].reshape(rows, width)

    # Row tile: ~target_block_bytes per block, sized in f32-equivalent elements
    # (the compute path upcasts sub-f32 inputs), rounded to the sublane pack.
    target_elems = max(sub * width, target_block_bytes // max(itemsize, 4))
    target_rows = max(sub, (target_elems // width) // sub * sub)

    if num_tc > 1 and rows > sub:
        # 2-TC chips (v7x): keep >= num_tc grid steps so both cores stream.
        per_core_rows = max(sub, pl.cdiv(pl.cdiv(rows, num_tc), sub) * sub)
        tr = min(target_rows, per_core_rows)
    elif rows <= target_rows:
        tr = rows  # single block covering the whole slab (full-dim block is legal)
    else:
        tr = target_rows  # multiple of `sub`; partial last block is masked
    grid = (pl.cdiv(rows, tr),)

    kernel = functools.partial(
        _sigmoid_range_kernel,
        scale=scale,
        shift=shift,
        upcast=jnp.dtype(dtype) != jnp.dtype(jnp.float32),
    )

    out2d = pl.pallas_call(
        kernel,
        out_shape=jax.ShapeDtypeStruct((rows, width), dtype),
        grid_spec=pltpu.PrefetchScalarGridSpec(
            num_scalar_prefetch=0,
            grid=grid,
            in_specs=[pl.BlockSpec((tr, width), lambda i: (i, 0))],
            out_specs=pl.BlockSpec((tr, width), lambda i: (i, 0)),
        ),
        compiler_params=pltpu.CompilerParams(
            dimension_semantics=("parallel",)),
    )(x2d)

    out_flat = out2d.reshape(-1)
    if n_tail:
        # TODO(synk): the reassembly concatenate still costs one extra output
        # pass for ragged sizes; acceptable vs. the old pad+slice (two passes).
        tail_out = _sigmoid_range_xla(x_flat[n_main:], scale, shift)
        out_flat = jnp.concatenate([out_flat, tail_out])
    return out_flat.reshape(orig_shape)


if __name__ == "__main__":
    # SigmoidRange(high, low): module has no parameters, just two scalars.
    high, low = 5.0, -1.0

    root = jax.random.PRNGKey(0)
    k1, k2 = jax.random.split(root)

    def ref_fn(v):
        return jax.nn.sigmoid(v) * (high - low) + low

    # 1) Demo shape through the Pallas path (force it: 8 KiB is below the
    #    default small-input bail-out, which would otherwise use fused XLA).
    x = jax.random.normal(k1, (2, 4, 16, 16), dtype=jnp.float32)  # NCHW-like
    out = jax.block_until_ready(sigmoid_range(x, high, low, min_pallas_bytes=0))
    assert out.shape == x.shape and out.dtype == x.dtype
    assert jnp.allclose(out, ref_fn(x), atol=1e-5, rtol=1e-5)

    # 2) Default path for the same small input (XLA bail-out) must match too.
    out_small = jax.block_until_ready(sigmoid_range(x, high, low))
    assert jnp.allclose(out_small, ref_fn(x), atol=1e-5, rtol=1e-5)

    # 3) Ragged flat size: 128-aligned prefix via the kernel + tiny XLA tail.
    xr = jax.random.normal(k2, (7, 150), dtype=jnp.float32)  # 1050 elems
    out_r = jax.block_until_ready(sigmoid_range(xr, high, low, min_pallas_bytes=0))
    assert out_r.shape == xr.shape and out_r.dtype == xr.dtype
    assert jnp.allclose(out_r, ref_fn(xr), atol=1e-5, rtol=1e-5)

    print("KERNEL_OK")
</pallas_src>

<mosaic_0001>
module attributes {stable_mosaic.version = 11 : i64} {
  func.func @_sigmoid_range_kernel(%arg0: i32, %arg1: memref<4x512xf32, #tpu.memory_space<vmem>>, %arg2: memref<4x512xf32, #tpu.memory_space<vmem>>) attributes {dimension_semantics = [#tpu.dimension_semantics<parallel>], iteration_bounds = array<i64: 1>, scalar_prefetch = 0 : i64, scratch_operands = 0 : i64, tpu.core_type = #tpu.core_type<tc>, window_params = [{transform_indices = @transform_0, window_bounds = array<i64: 4, 512>}, {transform_indices = @transform_1, window_bounds = array<i64: 4, 512>}]} {
    %c0 = arith.constant 0 : index
    %c0_0 = arith.constant 0 : index
    %0 = vector.load %arg1[%c0, %c0_0] : memref<4x512xf32, #tpu.memory_space<vmem>>, vector<4x512xf32>
    %cst = arith.constant 5.000000e-01 : f32
    %1 = vector.broadcast %cst : f32 to vector<4x512xf32>
    %2 = arith.mulf %0, %1 : vector<4x512xf32>
    %3 = math.tanh %2 : vector<4x512xf32>
    %cst_1 = arith.constant 3.000000e+00 : f32
    %4 = vector.broadcast %cst_1 : f32 to vector<4x512xf32>
    %5 = arith.mulf %3, %4 : vector<4x512xf32>
    %cst_2 = arith.constant 2.000000e+00 : f32
    %6 = vector.broadcast %cst_2 : f32 to vector<4x512xf32>
    %7 = arith.addf %5, %6 : vector<4x512xf32>
    %c0_3 = arith.constant 0 : index
    %c0_4 = arith.constant 0 : index
    %8 = vector.load %arg2[%c0_3, %c0_4] : memref<4x512xf32, #tpu.memory_space<vmem>>, vector<4x512xf32>
    tpu.vector_store %arg2[%c0_3, %c0_4], %7 {strides = array<i32>} : memref<4x512xf32, #tpu.memory_space<vmem>>, vector<4x512xf32>,
    return
  }
  func.func @transform_0(%arg0: i32) -> (i32, i32) {
    %c0_i32 = arith.constant 0 : i32
    %c0_i32_0 = arith.constant 0 : i32
    return %arg0, %c0_i32 : i32, i32
  }
  func.func @transform_1(%arg0: i32) -> (i32, i32) {
    %c0_i32 = arith.constant 0 : i32
    %c0_i32_0 = arith.constant 0 : i32
    return %arg0, %c0_i32 : i32, i32
  }
}

</mosaic_0001>

<bundles_post_ra>
// kernel: tpu_custom_call.1
= control target key start
LH: loop header
LB: loop body
LE: loop exit
PB: predicated region body
PF: predicated region fallthrough
CT: control target
= control target key end

     0   :  { %6 = vsyncpa [#allocation3], 0  ;;  %s138_s0 = inlined_call_operand.hbm [shape: f32[4,512], index: 0, kind: input, shape index: {}]   ;;  %s139_s1 = inlined_call_operand.hbm [shape: f32[4,512], index: 1, kind: output, shape index: {}]  }
   0x1   :  { %7 = vsyncpa [#allocation4], 0  ;;  %s102_s6 = smov [#allocation2]   ;;  %s54_s10 = scalar_lea.hbm %s138_s0, 256 }
   0x2   :  { %s14_s7 = sshll.u32 %s102_s6, 4  ;;  %p55_p0 = scmp.ne.s32.totalorder %s138_s0, %s54_s10  ;;  %s15_s7 = int_to_ptr.vmem [resolvable:$true] %s14_s7 }
   0x3   :  { %p58_p1 = scmp.lt.u32.totalorder %s54_s10, %s138_s0 }
   0x5   :  { %p60_p2 = pnand %p58_p1, %p55_p0 }
   0x7   :  { %63 = shalt.err (!%p60_p2)
}
   0x8   :  { %s64_s15 = scalar_lea.vmem %s15_s7, 256  ;;  %p69_p4 = scmp.lt.s32.totalorder %s15_s7, %s15_s7 }
   0x9   :  { %p65_p3 = scmp.ne.s32.totalorder %s15_s7, %s64_s15  ;;  %p70_p5 = scmp.lt.s32.totalorder %s64_s15, %s64_s15 }
   0xb   :  { %p71_p6 = por %p70_p5, %p69_p4 }
   0xd   :  { %p72_p7 = pnand %p71_p6, %p65_p3 }
   0xf   :  { %75 = shalt.err (!%p72_p7)
}
  0x10   :  { %17 = dma.hbm_to_vmem [thread:$0]  %s138_s0, 256, %s15_s7, [#allocation3]  }
  0x11   :  { %98 = dma.done.wait [#allocation3], 256  }
  0x12   :  { %99 = vsyncadd [#allocation3], 4294967040  ;;  %v21_v0 = vld [vmem:[#allocation2] sm:$0xff]  ;;  %v22_v1 = vld [vmem:[#allocation2 + $0x8] sm:$0xff]  ;;  %s103_s18 = smov [#allocation5]  }
  0x13   :  { %v23_v2 = vmul.f32 0.5, %v21_v0  ;;  %v24_v3 = vmul.f32 0.5, %v22_v1  ;;  %s39_s19 = sshll.u32 %s103_s18, 4  ;;  %s40_s19 = int_to_ptr.vmem [resolvable:$true] %s39_s19 }
  0x14   :  { %s76_s0 = scalar_lea.vmem %s40_s19, 256  ;;  %p81_p9 = scmp.lt.s32.totalorder %s40_s19, %s40_s19 }
  0x15   :  { %50 = vtanh.f32 %v23_v2  ;;  %p77_p8 = scmp.ne.s32.totalorder %s40_s19, %s76_s0  ;;  %p82_p10 = scmp.lt.s32.totalorder %s76_s0, %s76_s0 }
  0x16   :  { %52 = vtanh.f32 %v24_v3 }
  0x17   :  { %p83_p11 = por %p82_p10, %p81_p9 }
  0x19   :  { %p84_p12 = pnand %p83_p11, %p77_p8 }
  0x1f   :  { %v51_v4 = vpop.eup %50 }
  0x20   :  { %v53_v5 = vpop.eup %52  ;;  %v27_v6 = vmul.f32 3.0, %v51_v4 }
  0x21   :  { %v28_v7 = vmul.f32 3.0, %v53_v5 }
  0x22   :  { %v29_v8 = vadd.f32 2.0, %v27_v6 }
  0x23   :  { %v30_v9 = vadd.f32 2.0, %v28_v7 }
  0x24   :  { %31 = vst [vmem:[#allocation5] sm:$0xff] %v29_v8 }
  0x25   :  { %32 = vst [vmem:[#allocation5 + $0x8] sm:$0xff] %v30_v9 }
  0x26   :  { %87 = shalt.err (!%p84_p12)
}
  0x27   :  { %s88_s22 = scalar_lea.hbm %s139_s1, 256 }
  0x28   :  { %p89_p13 = scmp.ne.s32.totalorder %s139_s1, %s88_s22  ;;  %p92_p0 = scmp.lt.u32.totalorder %s88_s22, %s139_s1 }
  0x2a   :  { %p94_p1 = pnand %p92_p0, %p89_p13 }
  0x2c   :  { %97 = shalt.err (!%p94_p1)
}
  0x2d   :  { %42 = dma.vmem_to_hbm [thread:$0]  %s40_s19, 256, %s139_s1, [#allocation4]  }
  0x2e   :  { %100 = dma.done.wait [#allocation4], 256  }
  0x2f   :  { %101 = vsyncadd [#allocation4], 4294967040 }
  0x30   :  { %46 = vsyncpa [#allocation3], 1 }
  0x31   :  { %47 = vsyncpa [#allocation4], 1 }

</bundles_post_ra>
